<compile_context>
chip_gen: v6e
topology: v6e:2x2x1
jax: 0.10.0
libtpu: 0.0.40
codegen_flags: <defaults>
</compile_context>

<pallas_src>
import functools

import jax
import jax.numpy as jnp
from jax.experimental import pallas as pl
from jax.experimental.pallas import tpu as pltpu


def _round_up(x, m):
    return (x + m - 1) // m * m


def dgm_layer_kernel(
    x_ref, s_ref,
    wx_all_ref, ws_zgr_ref, b_zgr_ref, ws_h_ref, b_h_ref,
    out_ref,
    *, dim_S,
):
    x = x_ref[...]
    S = s_ref[...]

    # Fused lane-dense matmuls.
    pre_x = jnp.dot(x, wx_all_ref[...], preferred_element_type=jnp.float32)
    pre_zgr = (
        jnp.dot(S, ws_zgr_ref[...], preferred_element_type=jnp.float32)
        + pre_x[:, : 3 * dim_S]
        + b_zgr_ref[...]
    )

    # Ordered to keep at most ~3 gate-sized f32 tiles live at once.
    R = jnp.tanh(pre_zgr[:, 2 * dim_S : 3 * dim_S])
    SR = S * R
    H = jnp.tanh(
        pre_x[:, 3 * dim_S :]
        + jnp.dot(SR, ws_h_ref[...], preferred_element_type=jnp.float32)
        + b_h_ref[...]
    )
    G = jnp.tanh(pre_zgr[:, dim_S : 2 * dim_S])
    acc = (1.0 - G) * H
    Z = jnp.tanh(pre_zgr[:, :dim_S])
    out_ref[...] = acc + Z * S


def dgm_layer(x, S, params, *, tile_n=256):
    """x: (N, dim_x), S: (N, dim_S) -> (N, dim_S)."""
    N, dim_x = x.shape
    _, dim_S = S.shape

    # Pack / fuse weights lane-dense in the wrapper (one-time cost).
    wzx, wzs, bz = params["Z"]
    wgx, wgs, bg = params["G"]
    wrx, wrs, br = params["R"]
    whx, whs, bh = params["H"]
    wx_all = jnp.concatenate([wzx, wgx, wrx, whx], axis=1)   # (dim_x, 4*dim_S)
    ws_zgr = jnp.concatenate([wzs, wgs, wrs], axis=1)        # (dim_S, 3*dim_S)
    b_zgr = jnp.concatenate([bz, bg, br], axis=1)            # (1, 3*dim_S)

    # Row tiling: sublane-aligned tile, N padded up to a full grid of tiles.
    tile_n = min(tile_n, _round_up(N, 8))
    n_pad = _round_up(N, tile_n)
    if n_pad != N:
        x = jnp.pad(x, ((0, n_pad - N), (0, 0)))
        S = jnp.pad(S, ((0, n_pad - N), (0, 0)))
    grid = (n_pad // tile_n,)

    row_spec = lambda cols: pl.BlockSpec((tile_n, cols), lambda i: (i, 0))
    res_spec = lambda a: pl.BlockSpec(a.shape, lambda i: (0, 0))

    cost = pl.CostEstimate(
        flops=2 * n_pad * dim_S * (4 * dim_x + 4 * dim_S),
        transcendentals=4 * n_pad * dim_S,
        bytes_accessed=4 * n_pad * (dim_x + 2 * dim_S),
    )

    out = pl.pallas_call(
        functools.partial(dgm_layer_kernel, dim_S=dim_S),
        out_shape=jax.ShapeDtypeStruct((n_pad, dim_S), jnp.float32),
        grid=grid,
        in_specs=[
            row_spec(dim_x),      # x tile
            row_spec(dim_S),      # S tile
            res_spec(wx_all),     # VMEM-resident fused weights / biases
            res_spec(ws_zgr),
            res_spec(b_zgr),
            res_spec(whs),
            res_spec(bh),
        ],
        out_specs=row_spec(dim_S),
        compiler_params=pltpu.CompilerParams(
            dimension_semantics=("parallel",),
        ),
        cost_estimate=cost,
    )(x, S, wx_all, ws_zgr, b_zgr, whs, bh)
    return out[:N]


def init_params(key, dim_x, dim_S):
    """Deterministic PyTorch-Linear-style init: U(-1/sqrt(nIn), 1/sqrt(nIn))."""
    nIn = dim_x + dim_S
    bound = 1.0 / jnp.sqrt(jnp.float32(nIn))
    params = {}
    for g in ("Z", "G", "R", "H"):
        key, k_w, k_b = jax.random.split(key, 3)
        # Full weight (nIn, dim_S) for y = x_S @ W + b; split into x / S parts.
        w = jax.random.uniform(k_w, (nIn, dim_S), jnp.float32, -bound, bound)
        b = jax.random.uniform(k_b, (1, dim_S), jnp.float32, -bound, bound)
        params[g] = (w[:dim_x, :], w[dim_x:, :], b)
    return params


def dgm_layer_ref(x, S, params):
    def gate(g, s_in):
        wx, ws, b = params[g]
        return jnp.tanh(x @ wx + s_in @ ws + b)

    Z = gate("Z", S)
    G = gate("G", S)
    R = gate("R", S)
    H = gate("H", S * R)
    return (1.0 - G) * H + Z * S


if __name__ == "__main__":
    dim_x, dim_S = 4, 32
    key = jax.random.PRNGKey(0)
    k_p, key = jax.random.split(key)
    params = init_params(k_p, dim_x, dim_S)

    # Small case (single tile) and a case that exercises padding + grid > 1.
    for N in (8, 300):
        key, k_x, k_s = jax.random.split(key, 3)
        x = jax.random.normal(k_x, (N, dim_x), jnp.float32)
        S = jax.random.normal(k_s, (N, dim_S), jnp.float32)

        out = jax.block_until_ready(dgm_layer(x, S, params))
        ref = dgm_layer_ref(x, S, params)

        assert out.shape == (N, dim_S)
        assert jnp.allclose(out, ref, atol=1e-5, rtol=1e-5), f"mismatch at N={N}"

    print("KERNEL_OK")
</pallas_src>

<mosaic_0001>
module attributes {stable_mosaic.version = 11 : i64} {
  func.func @dgm_layer_kernel(%arg0: i32, %arg1: memref<8x4xf32, #tpu.memory_space<vmem>>, %arg2: memref<8x32xf32, #tpu.memory_space<vmem>>, %arg3: memref<4x128xf32, #tpu.memory_space<vmem>>, %arg4: memref<32x96xf32, #tpu.memory_space<vmem>>, %arg5: memref<1x96xf32, #tpu.memory_space<vmem>>, %arg6: memref<32x32xf32, #tpu.memory_space<vmem>>, %arg7: memref<1x32xf32, #tpu.memory_space<vmem>>, %arg8: memref<8x32xf32, #tpu.memory_space<vmem>>) attributes {dimension_semantics = [#tpu.dimension_semantics<parallel>], iteration_bounds = array<i64: 1>, scalar_prefetch = 0 : i64, scratch_operands = 0 : i64, tpu.core_type = #tpu.core_type<tc>, window_params = [{transform_indices = @transform_0, window_bounds = array<i64: 8, 4>}, {transform_indices = @transform_1, window_bounds = array<i64: 8, 32>}, {pipeline_mode = #tpu.pipeline_mode<synchronous>, transform_indices = @transform_2, window_bounds = array<i64: 4, 128>}, {pipeline_mode = #tpu.pipeline_mode<synchronous>, transform_indices = @transform_3, window_bounds = array<i64: 32, 96>}, {pipeline_mode = #tpu.pipeline_mode<synchronous>, transform_indices = @transform_4, window_bounds = array<i64: 1, 96>}, {pipeline_mode = #tpu.pipeline_mode<synchronous>, transform_indices = @transform_5, window_bounds = array<i64: 32, 32>}, {pipeline_mode = #tpu.pipeline_mode<synchronous>, transform_indices = @transform_6, window_bounds = array<i64: 1, 32>}, {transform_indices = @transform_7, window_bounds = array<i64: 8, 32>}]} {
    %c0 = arith.constant 0 : index
    %c0_0 = arith.constant 0 : index
    %0 = vector.load %arg1[%c0, %c0_0] : memref<8x4xf32, #tpu.memory_space<vmem>>, vector<8x4xf32>
    %c0_1 = arith.constant 0 : index
    %c0_2 = arith.constant 0 : index
    %1 = vector.load %arg2[%c0_1, %c0_2] : memref<8x32xf32, #tpu.memory_space<vmem>>, vector<8x32xf32>
    %c0_3 = arith.constant 0 : index
    %c0_4 = arith.constant 0 : index
    %2 = vector.load %arg3[%c0_3, %c0_4] : memref<4x128xf32, #tpu.memory_space<vmem>>, vector<4x128xf32>
    %cst = arith.constant dense<0.000000e+00> : vector<8x128xf32>
    %3 = tpu.matmul %0, %2, %cst {dimension_numbers = #tpu.dot_dimension_numbers<[1], [0], [0], [1], [0, 0, 1, 1], [], []>} : vector<8x4xf32>, vector<4x128xf32>, vector<8x128xf32> -> vector<8x128xf32>
    %c0_5 = arith.constant 0 : index
    %c0_6 = arith.constant 0 : index
    %4 = vector.load %arg4[%c0_5, %c0_6] : memref<32x96xf32, #tpu.memory_space<vmem>>, vector<32x96xf32>
    %cst_7 = arith.constant dense<0.000000e+00> : vector<8x96xf32>
    %5 = tpu.matmul %1, %4, %cst_7 {dimension_numbers = #tpu.dot_dimension_numbers<[1], [0], [0], [1], [0, 0, 1, 1], [], []>} : vector<8x32xf32>, vector<32x96xf32>, vector<8x96xf32> -> vector<8x96xf32>
    %6 = vector.extract_strided_slice %3 {offsets = [0, 0], sizes = [8, 96], strides = [1, 1]} : vector<8x128xf32> to vector<8x96xf32>
    %7 = arith.addf %5, %6 : vector<8x96xf32>
    %c0_8 = arith.constant 0 : index
    %c0_9 = arith.constant 0 : index
    %8 = vector.load %arg5[%c0_8, %c0_9] : memref<1x96xf32, #tpu.memory_space<vmem>>, vector<1x96xf32>
    %9 = vector.broadcast %8 : vector<1x96xf32> to vector<8x96xf32>
    %10 = arith.addf %7, %9 : vector<8x96xf32>
    %11 = vector.extract_strided_slice %10 {offsets = [0, 64], sizes = [8, 32], strides = [1, 1]} : vector<8x96xf32> to vector<8x32xf32>
    %12 = math.tanh %11 : vector<8x32xf32>
    %13 = arith.mulf %1, %12 : vector<8x32xf32>
    %14 = vector.extract_strided_slice %3 {offsets = [0, 96], sizes = [8, 32], strides = [1, 1]} : vector<8x128xf32> to vector<8x32xf32>
    %c0_10 = arith.constant 0 : index
    %c0_11 = arith.constant 0 : index
    %15 = vector.load %arg6[%c0_10, %c0_11] : memref<32x32xf32, #tpu.memory_space<vmem>>, vector<32x32xf32>
    %cst_12 = arith.constant dense<0.000000e+00> : vector<8x32xf32>
    %16 = tpu.matmul %13, %15, %cst_12 {dimension_numbers = #tpu.dot_dimension_numbers<[1], [0], [0], [1], [0, 0, 1, 1], [], []>} : vector<8x32xf32>, vector<32x32xf32>, vector<8x32xf32> -> vector<8x32xf32>
    %17 = arith.addf %14, %16 : vector<8x32xf32>
    %c0_13 = arith.constant 0 : index
    %c0_14 = arith.constant 0 : index
    %18 = vector.load %arg7[%c0_13, %c0_14] : memref<1x32xf32, #tpu.memory_space<vmem>>, vector<1x32xf32>
    %19 = vector.broadcast %18 : vector<1x32xf32> to vector<8x32xf32>
    %20 = arith.addf %17, %19 : vector<8x32xf32>
    %21 = math.tanh %20 : vector<8x32xf32>
    %22 = vector.extract_strided_slice %10 {offsets = [0, 32], sizes = [8, 32], strides = [1, 1]} : vector<8x96xf32> to vector<8x32xf32>
    %23 = math.tanh %22 : vector<8x32xf32>
    %cst_15 = arith.constant 1.000000e+00 : f32
    %24 = vector.broadcast %cst_15 : f32 to vector<8x32xf32>
    %25 = arith.subf %24, %23 : vector<8x32xf32>
    %26 = arith.mulf %25, %21 : vector<8x32xf32>
    %27 = vector.extract_strided_slice %10 {offsets = [0, 0], sizes = [8, 32], strides = [1, 1]} : vector<8x96xf32> to vector<8x32xf32>
    %28 = math.tanh %27 : vector<8x32xf32>
    %29 = arith.mulf %28, %1 : vector<8x32xf32>
    %30 = arith.addf %26, %29 : vector<8x32xf32>
    %c0_16 = arith.constant 0 : index
    %c0_17 = arith.constant 0 : index
    %31 = vector.load %arg8[%c0_16, %c0_17] : memref<8x32xf32, #tpu.memory_space<vmem>>, vector<8x32xf32>
    tpu.vector_store %arg8[%c0_16, %c0_17], %30 {strides = array<i32>} : memref<8x32xf32, #tpu.memory_space<vmem>>, vector<8x32xf32>,
    return
  }
  func.func @transform_0(%arg0: i32) -> (i32, i32) {
    %c0_i32 = arith.constant 0 : i32
    %c0_i32_0 = arith.constant 0 : i32
    return %arg0, %c0_i32 : i32, i32
  }
  func.func @transform_1(%arg0: i32) -> (i32, i32) {
    %c0_i32 = arith.constant 0 : i32
    %c0_i32_0 = arith.constant 0 : i32
    return %arg0, %c0_i32 : i32, i32
  }
  func.func @transform_2(%arg0: i32) -> (i32, i32) {
    %c0_i32 = arith.constant 0 : i32
    %c0_i32_0 = arith.constant 0 : i32
    %c0_i32_1 = arith.constant 0 : i32
    return %c0_i32, %c0_i32_0 : i32, i32
  }
  func.func @transform_3(%arg0: i32) -> (i32, i32) {
    %c0_i32 = arith.constant 0 : i32
    %c0_i32_0 = arith.constant 0 : i32
    %c0_i32_1 = arith.constant 0 : i32
    return %c0_i32, %c0_i32_0 : i32, i32
  }
  func.func @transform_4(%arg0: i32) -> (i32, i32) {
    %c0_i32 = arith.constant 0 : i32
    %c0_i32_0 = arith.constant 0 : i32
    %c0_i32_1 = arith.constant 0 : i32
    return %c0_i32, %c0_i32_0 : i32, i32
  }
  func.func @transform_5(%arg0: i32) -> (i32, i32) {
    %c0_i32 = arith.constant 0 : i32
    %c0_i32_0 = arith.constant 0 : i32
    %c0_i32_1 = arith.constant 0 : i32
    return %c0_i32, %c0_i32_0 : i32, i32
  }
  func.func @transform_6(%arg0: i32) -> (i32, i32) {
    %c0_i32 = arith.constant 0 : i32
    %c0_i32_0 = arith.constant 0 : i32
    %c0_i32_1 = arith.constant 0 : i32
    return %c0_i32, %c0_i32_0 : i32, i32
  }
  func.func @transform_7(%arg0: i32) -> (i32, i32) {
    %c0_i32 = arith.constant 0 : i32
    %c0_i32_0 = arith.constant 0 : i32
    return %arg0, %c0_i32 : i32, i32
  }
}

</mosaic_0001>

<bundles_post_ra>
// kernel: tpu_custom_call.1
= control target key start
LH: loop header
LB: loop body
LE: loop exit
PB: predicated region body
PF: predicated region fallthrough
CT: control target
= control target key end

     0   :  { %12 = vsyncpa [#allocation3], 0  ;;  %s559_s0 = inlined_call_operand.vmem [shape: f32[8,4], index: 0, kind: input, shape index: {}]   ;;  %s560_s1 = inlined_call_operand.vmem [shape: f32[8,32], index: 1, kind: input, shape index: {}]   ;;  %s561_s2 = inlined_call_operand.vmem [shape: f32[4,128], index: 2, kind: input, shape index: {}]   ;;  %s562_s3 = inlined_call_operand.hbm [shape: f32[32,96], index: 3, kind: input, shape index: {}]   ;;  %s563_s4 = inlined_call_operand.vmem [shape: f32[1,96], index: 4, kind: input, shape index: {}]   ;;  %s564_s5 = inlined_call_operand.hbm [shape: f32[32,32], index: 5, kind: input, shape index: {}]   ;;  %s565_s6 = inlined_call_operand.vmem [shape: f32[1,32], index: 6, kind: input, shape index: {}]   ;;  %s566_s7 = inlined_call_operand.hbm [shape: f32[8,32], index: 7, kind: output, shape index: {}]  }
   0x1   :  { %13 = vsyncpa [#allocation6], 0 }
   0x2   :  { %14 = vsyncpa [#allocation4], 0  ;;  %s479_s24 = smov [#allocation2]  }
   0x3   :  { %s26_s25 = sshll.u32 %s479_s24, 4  ;;  %s27_s25 = int_to_ptr.vmem [resolvable:$true] %s26_s25 }
   0x4   :  { %s421_s26 = scalar_lea.vmem %s27_s25, 512  ;;  %p426_p1 = scmp.lt.s32.totalorder %s27_s25, %s27_s25 }
   0x5   :  { %p422_p0 = scmp.ne.s32.totalorder %s27_s25, %s421_s26  ;;  %p427_p2 = scmp.lt.s32.totalorder %s421_s26, %s421_s26 }
   0x7   :  { %p428_p3 = por %p427_p2, %p426_p1 }
   0x9   :  { %p429_p4 = pnand %p428_p3, %p422_p0 }
   0xb   :  { %432 = shalt.err (!%p429_p4)
}
   0xc   :  { %s480_s27 = smov 128   ;;  %s481_s28 = smov 8  }
   0xd   :  { %32 = dma.hbm_to_vmem [thread:$0]  %s562_s3, 512, %s27_s25, [#allocation3], %s480_s27, %s480_s27, %s481_s28  }
   0xe   :  { %s482_s8 = smov [#allocation5]  }
   0xf   :  { %s40_s9 = sshll.u32 %s482_s8, 4  ;;  %s41_s9 = int_to_ptr.vmem [resolvable:$true] %s40_s9 }
  0x10   :  { %s441_s10 = scalar_lea.vmem %s41_s9, 512  ;;  %p446_p6 = scmp.lt.s32.totalorder %s41_s9, %s41_s9 }
  0x11   :  { %p442_p5 = scmp.ne.s32.totalorder %s41_s9, %s441_s10  ;;  %p447_p7 = scmp.lt.s32.totalorder %s441_s10, %s441_s10 }
  0x13   :  { %p448_p8 = por %p447_p7, %p446_p6 }
  0x15   :  { %p449_p9 = pnand %p448_p8, %p442_p5 }
  0x17   :  { %452 = shalt.err (!%p449_p9)
}
  0x18   :  { %46 = dma.hbm_to_vmem [thread:$0]  %s564_s5, 512, %s41_s9, [#allocation6], %s480_s27, %s480_s27, %s481_s28  }
  0x19   :  { %473 = dma.done.wait [#allocation3], 512  }
  0x1a   :  { %474 = vsyncadd [#allocation3], 4294966784 }
  0x1b   :  { %475 = dma.done.wait [#allocation6], 512  }
  0x1c   :  { %476 = vsyncadd [#allocation6], 4294966784  ;;  %v483_v0 = vmov 0.0   ;;  %vm484_vm0 = vmmov 0   ;;  %vm62_vm1 = vcmask 1043456   ;;  %vm58_vm2 = vcmask 31744  }
  0x1d   :  { %377 = vmatprep.subr.mxu1 %v483_v0  ;;  %372 = vmatprep.subr.mxu0 %v483_v0  ;;  %v139_v1 = vld [vmem:[#allocation2 + $0x18] sm:$0xff]  ;;  %v138_v2 = vld [vmem:[#allocation2 + $0x10] sm:$0xff]  ;;  %v57_v3 = vld [vmem:[%s561_s2] sm:$0xf]  ;;  %vm140_vm3 = vcmask 261120   ;;  %s486_s19 = smov 96  }
  0x1e   :  { %374 = vmatprep.mubr.msk.f32.mxu0 %vm484_vm0, %v483_v0  ;;  %385 = vmatprep.mubr.msk.f32.mxu1 %vm484_vm0, %v483_v0  ;;  %v55_v4 = vld [vmem:[%s559_s0] sm:$0xff]  ;;  %v137_v5 = vld [vmem:[#allocation2 + $0x8] sm:$0xff]  ;;  %v231_v8 = vld [vmem:[#allocation5 + $0x18] sm:$0xff] }
  0x1f   :  { %378 = vmatpush3.msra.mxu1 %v139_v1  ;;  %373 = vmatpush3.msk.msra.mxu0 %vm62_vm1, %v57_v3  ;;  %v136_v6 = vld [vmem:[#allocation2] sm:$0xff]  ;;  %v230_v9 = vld [vmem:[#allocation5 + $0x10] sm:$0xff]  ;;  %v229_v10 = vld [vmem:[#allocation5 + $0x8] sm:$0xff] }
  0x20   :  { %379 = vmatprep.subr.mxu1 %v483_v0  ;;  %375 = vmatmul.mubr.msk.f32.vlgmr.msra.gmra.mxu0 %vm58_vm2, %v55_v4  ;;  %v56_v7 = vld [vmem:[%s560_s1] sm:$0xff]  ;;  %s485_s1 = smov 64  }
  0x21   :  { %380 = vmatpush3.msra.mxu1 %v138_v2  ;;  %388 = vmatprep.subr.mxu0 %v483_v0  ;;  %v357_v14 = vld [vmem:[%s563_s4] ss:$0 sm:$0xff]  ;;  %s487_s4 = smov 32  }
  0x22   :  { %381 = vmatprep.subr.mxu1 %v483_v0  ;;  %396 = vmatprep.mubr.msk.f32.mxu0 %vm484_vm0, %v483_v0  ;;  %v228_v18 = vld [vmem:[#allocation5] sm:$0xff] }
  0x23   :  { %382 = vmatpush3.msra.mxu1 %v137_v5  ;;  %389 = vmatpush3.msra.mxu0 %v231_v8  ;;  %v359_v22 = vld [vmem:[%s565_s6] ss:$0 sm:$0xff]  ;;  %s488_s6 = smov [#allocation7]  }
  0x24   :  { %383 = vmatprep.subr.mxu1 %v483_v0  ;;  %390 = vmatprep.subr.mxu0 %v483_v0  ;;  %s344_s20 = sshll.u32 %s488_s6, 4  ;;  %s345_s20 = int_to_ptr.vmem [resolvable:$true] %s344_s20 }
  0x25   :  { %384 = vmatpush3.msra.mxu1 %v136_v6  ;;  %391 = vmatpush3.msra.mxu0 %v230_v9  ;;  %s453_s21 = scalar_lea.vmem %s345_s20, 128  ;;  %p458_p11 = scmp.lt.s32.totalorder %s345_s20, %s345_s20 }
  0x26   :  { %386 = vmatmul.mubr.msk.f32.vlgmr.msra.gmra.mxu1 %vm140_vm3, %v56_v7  ;;  %392 = vmatprep.subr.mxu0 %v483_v0  ;;  %p454_p10 = scmp.ne.s32.totalorder %s345_s20, %s453_s21  ;;  %p459_p12 = scmp.lt.s32.totalorder %s453_s21, %s453_s21 }
  0x27   :  { %393 = vmatpush3.msra.mxu0 %v229_v10  ;;  %316 = vrot.lane.b32.xlu1 %v359_v22, %s486_s19 }
  0x28   :  { %394 = vmatprep.subr.mxu0 %v483_v0  ;;  %p460_p13 = por %p459_p12, %p458_p11 }
  0x29   :  { %395 = vmatpush3.msra.mxu0 %v228_v18 }
  0x2a   :  { %p461_p0 = pnand %p460_p13, %p454_p10 }
  0x99   :  { %v317_v27 = vpop.permute.xlu1 %316 }
  0xe0   :  { %v132_v11 = vpop.f32.mrf.mxu0 }
  0xe2   :  { %v376_v12 = vpop.f32.mrf.mxu0 }
  0xe6   :  { %v210_v13 = vpop.f32.mrf.mxu1 }
  0xe7   :  { %v211_v15 = vadd.f32 %v210_v13, %v132_v11 }
  0xe8   :  { %v387_v16 = vpop.f32.mrf.mxu1 }
  0xe9   :  { %v221_v17 = vadd.f32 %v357_v14, %v211_v15 }
  0xeb   :  { %409 = vtanh.f32 %v221_v17 }
  0xf8   :  { %v410_v19 = vpop.eup %409 }
  0xf9   :  { %224 = vrot.lane.b32.xlu0 %v410_v19, %s485_s1  ;;  %v327_v25 = vmul.f32 %v410_v19, %v56_v7  ;;  %v321_v31 = vsub.f32 1.0, %v410_v19 }
 0x16b   :  { %v225_v20 = vpop.permute.xlu0 %224 }
 0x16c   :  { %v227_v21 = vmul.f32 %v225_v20, %v56_v7 }
 0x16e   :  { %397 = vmatmul.mubr.msk.f32.vlgmr.msra.gmra.mxu0 %vm140_vm3, %v227_v21 }
 0x22e   :  { %v301_v23 = vpop.f32.mrf.mxu0 }
 0x22f   :  { %306 = vrot.lane.b32.xlu0 %v301_v23, %s486_s19 }
 0x230   :  { %v398_v24 = vpop.f32.mrf.mxu0 }
 0x233   :  { %329 = vrot.lane.b32.xlu0 %v327_v25, %s487_s4 }
 0x2a1   :  { %v307_v26 = vpop.permute.xlu0 %306 }
 0x2a2   :  { %v309_v28 = vadd.f32 %v307_v26, %v132_v11 }
 0x2a4   :  { %v319_v29 = vadd.f32 %v317_v27, %v309_v28 }
 0x2a5   :  { %v330_v34 = vpop.permute.xlu0 %329 }
 0x2a6   :  { %411 = vtanh.f32 %v319_v29 }
 0x2b3   :  { %v412_v30 = vpop.eup %411 }
 0x2b4   :  { %323 = vrot.lane.b32.xlu1 %v412_v30, %s485_s1 }
 0x326   :  { %v324_v32 = vpop.permute.xlu1 %323 }
 0x327   :  { %v326_v33 = vmul.f32 %v324_v32, %v321_v31 }
 0x329   :  { %v332_v35 = vadd.f32 %v330_v34, %v326_v33 }
 0x32b   :  { %334 = vrot.lane.b32.xlu1 %v332_v35, %s486_s19 }
 0x39d   :  { %v335_v36 = vpop.permute.xlu1 %334 }
 0x39e   :  { %337 = vst.msk [vmem:[#allocation7] sm:$0xff] %vm140_vm3, %v335_v36 }
 0x39f   :  { %464 = shalt.err (!%p461_p0)
}
 0x3a0   :  { %347 = dma.vmem_to_hbm [thread:$0]  %s345_s20, 128, %s566_s7, [#allocation4]  }
 0x3a1   :  { %477 = dma.done.wait [#allocation4], 128  }
 0x3a2   :  { %478 = vsyncadd [#allocation4], 4294967168 }
 0x3a3   :  { %351 = vsyncpa [#allocation3], 1 }
 0x3a4   :  { %352 = vsyncpa [#allocation6], 1 }
 0x3a5   :  { %353 = vsyncpa [#allocation4], 1 }

</bundles_post_ra>
